<compile_context>
chip_gen: v5e
topology: v5e:2x2
jax: 0.10.0
libtpu: 0.0.40
codegen_flags: <defaults>
</compile_context>

<pallas_src>
import math
import numpy as np
import jax
import jax.numpy as jnp
from jax.experimental import pallas as pl
from jax.experimental.pallas import tpu as pltpu

B, C, H, W = 2, 4, 16, 16          # batch, channels (= dim), spatial
REDUCTION = 3
CH = max(C // REDUCTION, 1)        # SE hidden width (= 1)
K = 3                              # conv kernel size
OFFSET = 1.0                       # SELayer offset
H2, W2 = 2 * H, 2 * W              # output spatial size
CW = C * W                         # packed input lanes per batch (64)
CW2 = C * W2                       # packed output lanes per batch (128)


def _bilinear_matrix(n_in: int) -> np.ndarray:
    """Row-interpolation matrix for nn.Upsample(scale_factor=2, mode='bilinear',
    align_corners=False): out = M @ in."""
    n_out = 2 * n_in
    m = np.zeros((n_out, n_in), np.float32)
    for o in range(n_out):
        src = max((o + 0.5) / 2.0 - 0.5, 0.0)
        i0 = min(int(math.floor(src)), n_in - 1)
        i1 = i0 + 1 if i0 < n_in - 1 else i0
        lam = src - i0
        m[o, i0] += 1.0 - lam
        m[o, i1] += lam
    return m


def upsample_kernel(x_ref, m1_ref, m2_ref, uw_ref, g_ref, a_ref, bias_ref, o_ref):
    x = x_ref[...]                                               # (H, C*W) = (16, 64) f32

    # ---- SELayer gate: global mean + 2-layer MLP + sigmoid, VPU/XLU only ----
    colsum = jnp.sum(x, axis=0, keepdims=True)                   # (1, 64)
    gate_logit = jnp.zeros((1, CW), jnp.float32)
    for j in range(CH):                                          # static, CH = 1
        hid_j = jnp.maximum(
            jnp.sum(colsum * m1_ref[j:j + 1, :], axis=1, keepdims=True), 0.0)   # (1, 1)
        gate_logit = gate_logit + hid_j * m2_ref[j:j + 1, :]
    gate = jax.nn.sigmoid(gate_logit)                            # (1, 64)

    z = (x + OFFSET) * gate                                      # SE scale
    z = z * jax.nn.sigmoid(z)                                    # SiLU

    # ---- column bilinear 2x upsample (block-diag over C): (16,64)@(64,128) ----
    zc = jnp.dot(z.astype(jnp.bfloat16), uw_ref[...],
                 preferred_element_type=jnp.float32)             # (16, 128) f32
    zc_b = zc.astype(jnp.bfloat16)

    # ---- 3x3 conv: banded G per vertical tap, then row upsample / vertical taps,
    #      accumulated in f32 (no concat slab, no extra full MXU drain) ----
    acc = jnp.zeros((H2, CW2), jnp.float32)
    for k in range(K):                                           # static, K = 3
        qk = jnp.dot(zc_b, g_ref[k], preferred_element_type=jnp.float32)   # (16, 128)
        acc = acc + jnp.dot(a_ref[k], qk.astype(jnp.bfloat16),
                            preferred_element_type=jnp.float32)            # (32, 128)

    o_ref[...] = (acc + bias_ref[...]).astype(o_ref.dtype)

    # TODO(synk): the ratio != 1 nearest-interpolate branch and the image_size
    # (ConvTranspose2d + divisor) branch are dead for the default constructor
    # args and are not implemented here.


def build_upsample_operators(w1, w2, conv_w, conv_b):
    """One-time (layer-init) precompute; independent of x.  Fuses the SE MLP into
    per-lane rows, the bilinear upsample + conv zero-pad into bf16 matmul
    operators, and the 3x3 conv into banded bf16 block matrices (no batch kron)."""
    # SE fc1 fused with the HxW mean (lane = c*W + w); fc2 expanded per lane.
    m1 = jnp.repeat(jnp.asarray(w1, jnp.float32), W, axis=1) / float(H * W)   # (CH, C*W)
    m2 = jnp.repeat(jnp.asarray(w2, jnp.float32).T, W, axis=1)                # (CH, C*W)

    # Column bilinear 2x operator, block-diagonal over C (lane (c,w) -> (c,J)).
    uw = np.kron(np.eye(C, dtype=np.float32), _bilinear_matrix(W).T)          # (64, 128)

    # Banded conv matrices with the kw zero-pad folded in (clipped border taps):
    # G_kh[(c_in, j'), (c_out, j)] = conv_w[c_out, c_in, kh, j'-j+1] if |j'-j| <= 1.
    shift = np.zeros((K, W2, W2), np.float32)
    for kw in range(K):
        for j in range(W2):
            jp = j + kw - 1
            if 0 <= jp < W2:
                shift[kw, jp, j] = 1.0
    cw = np.asarray(conv_w, np.float32)
    g = np.stack(
        [np.einsum('oik,kpj->ipoj', cw[:, :, kh, :], shift).reshape(CW2, CW2)
         for kh in range(K)], axis=0)                                         # (3, 128, 128)

    # Row bilinear operators, one per vertical tap kh (conv row zero-pad folded in):
    # A_kh[i, h] = UH[i + kh - 1, h] when that padded row is interior, else 0.
    uh_pad = np.zeros((H2 + 2, H), np.float32)
    uh_pad[1:-1, :] = _bilinear_matrix(H)
    a = np.stack([uh_pad[kh:kh + H2, :] for kh in range(K)], axis=0)          # (3, 32, 16)

    bias_row = jnp.repeat(jnp.asarray(conv_b, jnp.float32), W2)[None, :]      # (1, 128)

    return (m1, m2,
            jnp.asarray(uw, jnp.bfloat16),
            jnp.asarray(g, jnp.bfloat16),
            jnp.asarray(a, jnp.bfloat16),
            bias_row)


@jax.jit
def upsample_forward(x, ops):
    m1, m2, uw, g, a, bias_row = ops

    # Pack (B, C, H, W) -> (B, H, C*W): per-batch lane index = c*W + w.
    x_packed = x.transpose(0, 2, 1, 3).reshape(B, H, CW)

    out_packed = pl.pallas_call(
        upsample_kernel,
        out_shape=jax.ShapeDtypeStruct((B, H2, CW2), jnp.float32),
        grid=(B,),
        in_specs=[
            pl.BlockSpec((None, H, CW), lambda b: (b, 0, 0)),        # x (per-batch block)
            pl.BlockSpec((CH, CW), lambda b: (0, 0)),                # SE fc1 (fused mean)
            pl.BlockSpec((CH, CW), lambda b: (0, 0)),                # SE fc2 (per lane)
            pl.BlockSpec((CW, CW2), lambda b: (0, 0)),               # column upsample
            pl.BlockSpec((K, CW2, CW2), lambda b: (0, 0, 0)),        # banded conv taps
            pl.BlockSpec((K, H2, H), lambda b: (0, 0, 0)),           # row upsample taps
            pl.BlockSpec((1, CW2), lambda b: (0, 0)),                # conv bias (packed)
        ],
        out_specs=pl.BlockSpec((None, H2, CW2), lambda b: (b, 0, 0)),
        compiler_params=pltpu.CompilerParams(
            dimension_semantics=("parallel",)),                      # v7x: both TCs used
    )(x_packed, m1, m2, uw, g, a, bias_row)

    # Unpack lanes back to NCHW.
    return out_packed.reshape(B, H2, C, W2).transpose(0, 2, 1, 3)    # (B, C, H2, W2)


def reference(x, w1, w2, conv_w, conv_b):
    """Pure-JAX f32 reference of the same forward pass."""
    hp = jax.lax.Precision.HIGHEST
    uh = jnp.asarray(_bilinear_matrix(H))                            # (2H, H)
    uwt = jnp.asarray(_bilinear_matrix(W).T)                         # (W, 2W)
    mean = jnp.mean(x, axis=(2, 3))                                  # (B, C)
    hid = jax.nn.relu(jnp.einsum('bc,hc->bh', mean, w1, precision=hp))
    y = jax.nn.sigmoid(jnp.einsum('bh,ch->bc', hid, w2, precision=hp))
    z = (x + OFFSET) * y[:, :, None, None]
    z = z * jax.nn.sigmoid(z)                                        # SiLU
    up = jnp.einsum('Oh,bchw->bcOw', uh, z, precision=hp)
    up = jnp.einsum('bchw,wW->bchW', up, uwt, precision=hp)
    out = jax.lax.conv_general_dilated(
        up, conv_w, window_strides=(1, 1), padding=((1, 1), (1, 1)),
        dimension_numbers=('NCHW', 'OIHW', 'NCHW'), precision=hp)
    return out + conv_b[None, :, None, None]


if __name__ == "__main__":
    key = jax.random.PRNGKey(0)
    kx, k1, k2, k3, k4 = jax.random.split(key, 5)
    x = jax.random.normal(kx, (B, C, H, W), jnp.float32)
    w1 = jax.random.normal(k1, (CH, C), jnp.float32) * (1.0 / math.sqrt(C))
    w2 = jax.random.normal(k2, (C, CH), jnp.float32) * (1.0 / math.sqrt(CH))
    conv_w = jax.random.normal(k3, (C, C, K, K), jnp.float32) * (1.0 / math.sqrt(C * K * K))
    conv_b = jax.random.normal(k4, (C,), jnp.float32) * 0.1

    # Operator build happens ONCE (layer init), not per forward call.
    ops = build_upsample_operators(w1, w2, conv_w, conv_b)

    out = jax.block_until_ready(upsample_forward(x, ops))

    ref = reference(x, w1, w2, conv_w, conv_b)
    assert out.shape == (B, C, H2, W2)
    # bf16 MXU operands (per perf review) give ~0.4% per-operand rounding, so the
    # check against the f32 reference uses a correspondingly looser tolerance.
    if not np.allclose(np.asarray(out), np.asarray(ref), atol=2e-2, rtol=2e-2):
        err = float(np.max(np.abs(np.asarray(out) - np.asarray(ref))))
        raise AssertionError(f"Pallas kernel does not match JAX reference (max err {err})")
    print("KERNEL_OK")
</pallas_src>

<mosaic_0001>
module attributes {stable_mosaic.version = 11 : i64} {
  func.func @upsample_kernel(%arg0: i32, %arg1: memref<1x16x64xf32, #tpu.memory_space<vmem>>, %arg2: memref<1x64xf32, #tpu.memory_space<vmem>>, %arg3: memref<1x64xf32, #tpu.memory_space<vmem>>, %arg4: memref<64x128xbf16, #tpu.memory_space<vmem>>, %arg5: memref<3x128x128xbf16, #tpu.memory_space<vmem>>, %arg6: memref<3x32x16xbf16, #tpu.memory_space<vmem>>, %arg7: memref<1x128xf32, #tpu.memory_space<vmem>>, %arg8: memref<1x32x128xf32, #tpu.memory_space<vmem>>) attributes {dimension_semantics = [#tpu.dimension_semantics<parallel>], iteration_bounds = array<i64: 2>, scalar_prefetch = 0 : i64, scratch_operands = 0 : i64, tpu.core_type = #tpu.core_type<tc>, window_params = [{transform_indices = @transform_0, window_bounds = array<i64: 1, 16, 64>}, {pipeline_mode = #tpu.pipeline_mode<synchronous>, transform_indices = @transform_1, window_bounds = array<i64: 1, 64>}, {pipeline_mode = #tpu.pipeline_mode<synchronous>, transform_indices = @transform_2, window_bounds = array<i64: 1, 64>}, {pipeline_mode = #tpu.pipeline_mode<synchronous>, transform_indices = @transform_3, window_bounds = array<i64: 64, 128>}, {pipeline_mode = #tpu.pipeline_mode<synchronous>, transform_indices = @transform_4, window_bounds = array<i64: 3, 128, 128>}, {pipeline_mode = #tpu.pipeline_mode<synchronous>, transform_indices = @transform_5, window_bounds = array<i64: 3, 32, 16>}, {pipeline_mode = #tpu.pipeline_mode<synchronous>, transform_indices = @transform_6, window_bounds = array<i64: 1, 128>}, {transform_indices = @transform_7, window_bounds = array<i64: 1, 32, 128>}]} {
    %c0 = arith.constant 0 : index
    %c0_0 = arith.constant 0 : index
    %c0_1 = arith.constant 0 : index
    %0 = vector.load %arg1[%c0, %c0_0, %c0_1] : memref<1x16x64xf32, #tpu.memory_space<vmem>>, vector<1x16x64xf32>
    %1 = vector.shape_cast %0 : vector<1x16x64xf32> to vector<16x64xf32>
    %cst = arith.constant dense<0.000000e+00> : vector<64xf32>
    %2 = vector.multi_reduction <add>, %1, %cst [0] : vector<16x64xf32> to vector<64xf32>
    %3 = vector.shape_cast %2 : vector<64xf32> to vector<1x64xf32>
    %cst_2 = arith.constant 0.000000e+00 : f32
    %4 = vector.broadcast %cst_2 : f32 to vector<1x64xf32>
    %c0_3 = arith.constant 0 : index
    %c0_4 = arith.constant 0 : index
    %5 = vector.load %arg2[%c0_3, %c0_4] : memref<1x64xf32, #tpu.memory_space<vmem>>, vector<1x64xf32>
    %6 = arith.mulf %3, %5 : vector<1x64xf32>
    %cst_5 = arith.constant dense<0.000000e+00> : vector<1xf32>
    %7 = vector.multi_reduction <add>, %6, %cst_5 [1] : vector<1x64xf32> to vector<1xf32>
    %8 = vector.shape_cast %7 : vector<1xf32> to vector<1x1xf32>
    %cst_6 = arith.constant 0.000000e+00 : f32
    %9 = vector.broadcast %cst_6 : f32 to vector<1x1xf32>
    %10 = arith.maximumf %8, %9 : vector<1x1xf32>
    %c0_7 = arith.constant 0 : index
    %c0_8 = arith.constant 0 : index
    %11 = vector.load %arg3[%c0_7, %c0_8] : memref<1x64xf32, #tpu.memory_space<vmem>>, vector<1x64xf32>
    %12 = vector.broadcast %10 : vector<1x1xf32> to vector<1x64xf32>
    %13 = arith.mulf %12, %11 : vector<1x64xf32>
    %14 = arith.addf %4, %13 : vector<1x64xf32>
    %15 = arith.negf %14 : vector<1x64xf32>
    %16 = math.exp %15 : vector<1x64xf32>
    %cst_9 = arith.constant 1.000000e+00 : f32
    %17 = vector.broadcast %cst_9 : f32 to vector<1x64xf32>
    %18 = arith.addf %17, %16 : vector<1x64xf32>
    %19 = arith.divf %17, %18 : vector<1x64xf32>
    %cst_10 = arith.constant 1.000000e+00 : f32
    %20 = vector.broadcast %cst_10 : f32 to vector<16x64xf32>
    %21 = arith.addf %1, %20 : vector<16x64xf32>
    %22 = vector.broadcast %19 : vector<1x64xf32> to vector<16x64xf32>
    %23 = arith.mulf %21, %22 : vector<16x64xf32>
    %24 = arith.negf %23 : vector<16x64xf32>
    %25 = math.exp %24 : vector<16x64xf32>
    %cst_11 = arith.constant 1.000000e+00 : f32
    %26 = vector.broadcast %cst_11 : f32 to vector<16x64xf32>
    %27 = arith.addf %26, %25 : vector<16x64xf32>
    %28 = arith.divf %26, %27 : vector<16x64xf32>
    %29 = arith.mulf %23, %28 : vector<16x64xf32>
    %30 = arith.truncf %29 : vector<16x64xf32> to vector<16x64xbf16>
    %c0_12 = arith.constant 0 : index
    %c0_13 = arith.constant 0 : index
    %31 = vector.load %arg4[%c0_12, %c0_13] : memref<64x128xbf16, #tpu.memory_space<vmem>>, vector<64x128xbf16>
    %cst_14 = arith.constant dense<0.000000e+00> : vector<16x128xf32>
    %32 = tpu.matmul %30, %31, %cst_14 {dimension_numbers = #tpu.dot_dimension_numbers<[1], [0], [0], [1], [0, 0, 1, 1], [], []>} : vector<16x64xbf16>, vector<64x128xbf16>, vector<16x128xf32> -> vector<16x128xf32>
    %33 = arith.truncf %32 : vector<16x128xf32> to vector<16x128xbf16>
    %cst_15 = arith.constant 0.000000e+00 : f32
    %34 = vector.broadcast %cst_15 : f32 to vector<32x128xf32>
    %c0_16 = arith.constant 0 : index
    %c0_17 = arith.constant 0 : index
    %c0_18 = arith.constant 0 : index
    %35 = vector.load %arg5[%c0_16, %c0_17, %c0_18] : memref<3x128x128xbf16, #tpu.memory_space<vmem>>, vector<1x128x128xbf16>
    %36 = vector.shape_cast %35 : vector<1x128x128xbf16> to vector<128x128xbf16>
    %cst_19 = arith.constant dense<0.000000e+00> : vector<16x128xf32>
    %37 = tpu.matmul %33, %36, %cst_19 {dimension_numbers = #tpu.dot_dimension_numbers<[1], [0], [0], [1], [0, 0, 1, 1], [], []>} : vector<16x128xbf16>, vector<128x128xbf16>, vector<16x128xf32> -> vector<16x128xf32>
    %c0_20 = arith.constant 0 : index
    %c0_21 = arith.constant 0 : index
    %c0_22 = arith.constant 0 : index
    %38 = vector.load %arg6[%c0_20, %c0_21, %c0_22] : memref<3x32x16xbf16, #tpu.memory_space<vmem>>, vector<1x32x16xbf16>
    %39 = vector.shape_cast %38 : vector<1x32x16xbf16> to vector<32x16xbf16>
    %40 = arith.truncf %37 : vector<16x128xf32> to vector<16x128xbf16>
    %cst_23 = arith.constant dense<0.000000e+00> : vector<32x128xf32>
    %41 = tpu.matmul %39, %40, %cst_23 {dimension_numbers = #tpu.dot_dimension_numbers<[1], [0], [0], [1], [0, 0, 1, 1], [], []>} : vector<32x16xbf16>, vector<16x128xbf16>, vector<32x128xf32> -> vector<32x128xf32>
    %42 = arith.addf %34, %41 : vector<32x128xf32>
    %c1 = arith.constant 1 : index
    %c0_24 = arith.constant 0 : index
    %c0_25 = arith.constant 0 : index
    %43 = vector.load %arg5[%c1, %c0_24, %c0_25] : memref<3x128x128xbf16, #tpu.memory_space<vmem>>, vector<1x128x128xbf16>
    %44 = vector.shape_cast %43 : vector<1x128x128xbf16> to vector<128x128xbf16>
    %cst_26 = arith.constant dense<0.000000e+00> : vector<16x128xf32>
    %45 = tpu.matmul %33, %44, %cst_26 {dimension_numbers = #tpu.dot_dimension_numbers<[1], [0], [0], [1], [0, 0, 1, 1], [], []>} : vector<16x128xbf16>, vector<128x128xbf16>, vector<16x128xf32> -> vector<16x128xf32>
    %c1_27 = arith.constant 1 : index
    %c0_28 = arith.constant 0 : index
    %c0_29 = arith.constant 0 : index
    %46 = vector.load %arg6[%c1_27, %c0_28, %c0_29] : memref<3x32x16xbf16, #tpu.memory_space<vmem>>, vector<1x32x16xbf16>
    %47 = vector.shape_cast %46 : vector<1x32x16xbf16> to vector<32x16xbf16>
    %48 = arith.truncf %45 : vector<16x128xf32> to vector<16x128xbf16>
    %cst_30 = arith.constant dense<0.000000e+00> : vector<32x128xf32>
    %49 = tpu.matmul %47, %48, %cst_30 {dimension_numbers = #tpu.dot_dimension_numbers<[1], [0], [0], [1], [0, 0, 1, 1], [], []>} : vector<32x16xbf16>, vector<16x128xbf16>, vector<32x128xf32> -> vector<32x128xf32>
    %50 = arith.addf %42, %49 : vector<32x128xf32>
    %c2 = arith.constant 2 : index
    %c0_31 = arith.constant 0 : index
    %c0_32 = arith.constant 0 : index
    %51 = vector.load %arg5[%c2, %c0_31, %c0_32] : memref<3x128x128xbf16, #tpu.memory_space<vmem>>, vector<1x128x128xbf16>
    %52 = vector.shape_cast %51 : vector<1x128x128xbf16> to vector<128x128xbf16>
    %cst_33 = arith.constant dense<0.000000e+00> : vector<16x128xf32>
    %53 = tpu.matmul %33, %52, %cst_33 {dimension_numbers = #tpu.dot_dimension_numbers<[1], [0], [0], [1], [0, 0, 1, 1], [], []>} : vector<16x128xbf16>, vector<128x128xbf16>, vector<16x128xf32> -> vector<16x128xf32>
    %c2_34 = arith.constant 2 : index
    %c0_35 = arith.constant 0 : index
    %c0_36 = arith.constant 0 : index
    %54 = vector.load %arg6[%c2_34, %c0_35, %c0_36] : memref<3x32x16xbf16, #tpu.memory_space<vmem>>, vector<1x32x16xbf16>
    %55 = vector.shape_cast %54 : vector<1x32x16xbf16> to vector<32x16xbf16>
    %56 = arith.truncf %53 : vector<16x128xf32> to vector<16x128xbf16>
    %cst_37 = arith.constant dense<0.000000e+00> : vector<32x128xf32>
    %57 = tpu.matmul %55, %56, %cst_37 {dimension_numbers = #tpu.dot_dimension_numbers<[1], [0], [0], [1], [0, 0, 1, 1], [], []>} : vector<32x16xbf16>, vector<16x128xbf16>, vector<32x128xf32> -> vector<32x128xf32>
    %58 = arith.addf %50, %57 : vector<32x128xf32>
    %c0_38 = arith.constant 0 : index
    %c0_39 = arith.constant 0 : index
    %59 = vector.load %arg7[%c0_38, %c0_39] : memref<1x128xf32, #tpu.memory_space<vmem>>, vector<1x128xf32>
    %60 = vector.broadcast %59 : vector<1x128xf32> to vector<32x128xf32>
    %61 = arith.addf %58, %60 : vector<32x128xf32>
    %c0_40 = arith.constant 0 : index
    %c0_41 = arith.constant 0 : index
    %c0_42 = arith.constant 0 : index
    %62 = vector.load %arg8[%c0_40, %c0_41, %c0_42] : memref<1x32x128xf32, #tpu.memory_space<vmem>>, vector<1x32x128xf32>
    %63 = vector.shape_cast %62 : vector<1x32x128xf32> to vector<32x128xf32>
    %64 = vector.shape_cast %61 : vector<32x128xf32> to vector<1x32x128xf32>
    tpu.vector_store %arg8[%c0_40, %c0_41, %c0_42], %64 {strides = array<i32>} : memref<1x32x128xf32, #tpu.memory_space<vmem>>, vector<1x32x128xf32>,
    return
  }
  func.func @transform_0(%arg0: i32) -> (i32, i32, i32) {
    %c0_i32 = arith.constant 0 : i32
    %c0_i32_0 = arith.constant 0 : i32
    %c0_i32_1 = arith.constant 0 : i32
    return %arg0, %c0_i32, %c0_i32_0 : i32, i32, i32
  }
  func.func @transform_1(%arg0: i32) -> (i32, i32) {
    %c0_i32 = arith.constant 0 : i32
    %c0_i32_0 = arith.constant 0 : i32
    %c0_i32_1 = arith.constant 0 : i32
    return %c0_i32, %c0_i32_0 : i32, i32
  }
  func.func @transform_2(%arg0: i32) -> (i32, i32) {
    %c0_i32 = arith.constant 0 : i32
    %c0_i32_0 = arith.constant 0 : i32
    %c0_i32_1 = arith.constant 0 : i32
    return %c0_i32, %c0_i32_0 : i32, i32
  }
  func.func @transform_3(%arg0: i32) -> (i32, i32) {
    %c0_i32 = arith.constant 0 : i32
    %c0_i32_0 = arith.constant 0 : i32
    %c0_i32_1 = arith.constant 0 : i32
    return %c0_i32, %c0_i32_0 : i32, i32
  }
  func.func @transform_4(%arg0: i32) -> (i32, i32, i32) {
    %c0_i32 = arith.constant 0 : i32
    %c0_i32_0 = arith.constant 0 : i32
    %c0_i32_1 = arith.constant 0 : i32
    %c0_i32_2 = arith.constant 0 : i32
    return %c0_i32, %c0_i32_0, %c0_i32_1 : i32, i32, i32
  }
  func.func @transform_5(%arg0: i32) -> (i32, i32, i32) {
    %c0_i32 = arith.constant 0 : i32
    %c0_i32_0 = arith.constant 0 : i32
    %c0_i32_1 = arith.constant 0 : i32
    %c0_i32_2 = arith.constant 0 : i32
    return %c0_i32, %c0_i32_0, %c0_i32_1 : i32, i32, i32
  }
  func.func @transform_6(%arg0: i32) -> (i32, i32) {
    %c0_i32 = arith.constant 0 : i32
    %c0_i32_0 = arith.constant 0 : i32
    %c0_i32_1 = arith.constant 0 : i32
    return %c0_i32, %c0_i32_0 : i32, i32
  }
  func.func @transform_7(%arg0: i32) -> (i32, i32, i32) {
    %c0_i32 = arith.constant 0 : i32
    %c0_i32_0 = arith.constant 0 : i32
    %c0_i32_1 = arith.constant 0 : i32
    return %arg0, %c0_i32, %c0_i32_0 : i32, i32, i32
  }
}

</mosaic_0001>

<bundles_post_ra>
// kernel: upsample_forward.1
= control target key start
LH: loop header
LB: loop body
LE: loop exit
PB: predicated region body
PF: predicated region fallthrough
CT: control target
= control target key end

     0   :  { %s1150_s24 = smov 0   ;;  %s1291_s0 = inlined_call_operand.vmem [shape: f32[2,16,64], index: 0, kind: input, shape index: {}]   ;;  %s1292_s1 = inlined_call_operand.vmem [shape: f32[1,64], index: 1, kind: input, shape index: {}]   ;;  %s1293_s2 = inlined_call_operand.vmem [shape: f32[1,64], index: 2, kind: input, shape index: {}]   ;;  %s1294_s3 = inlined_call_operand.vmem [shape: bf16[64,128], index: 3, kind: input, shape index: {}]   ;;  %s1295_s4 = inlined_call_operand.vmem [shape: bf16[3,128,128], index: 4, kind: input, shape index: {}]   ;;  %s1296_s5 = inlined_call_operand.vmem [shape: bf16[3,32,16], index: 5, kind: input, shape index: {}]   ;;  %s1297_s6 = inlined_call_operand.vmem [shape: f32[1,128], index: 6, kind: input, shape index: {}]   ;;  %s1298_s7 = inlined_call_operand.vmem [shape: f32[2,32,128], index: 7, kind: output, shape index: {}]  }
   0x1 LB: > { %s847_s25 = sadd.s32 4294967295, %s1108_s24   ;;  %p851_p0 = scmp.ge.s32.totalorder %s1108_s24, 1  ;;  %s1108_s24 = sphi %s1150_s24, %s17_s24  }
   0x2   : > { %p237_p1 = scmp.lt.s32.totalorder %s1108_s24, 3 }
   0x4   : > { %p238_p2 = pnand %p851_p0, %p237_p1 }
   0x5   : > { %p269_p3 = scmp.lt.s32.totalorder (!%p238_p2), %s847_s25, 1 }
   0x6   : > { %241 = sbr.rel (%p238_p2) target bundleno = 821 (0x335), region = 48 }
   0xb   : > { %s1300_s25 = smov (!%p269_p3, %s847_s25), 1  ;;  %vm282_vm0 = vcmask 523264   ;;  %v292_v10 = vld [vmem:[%s1292_s1] sm:$0x1]  ;;  %vm294_vm1 = vcmask 516096   ;;  %v1049_v14 = vld [vmem:[%s1294_s3 + $0x18] sm:$0xff] }
   0xc   : > { %s1044_s26 = sshll.u32 %s1300_s25, 4  ;;  %406 = vmatpush.bf16.msra.mxu0 %v1049_v14  ;;  %v1048_v15 = vld [vmem:[%s1294_s3 + $0x10] sm:$0xff]  ;;  %v1047_v16 = vld [vmem:[%s1294_s3 + $0x8] sm:$0xff]  ;;  %v299_v18 = vld [vmem:[%s1293_s2] sm:$0x1]  ;;  %vm595_vm14 = vcmask 130048  }
   0xd   : > { %s273_s29 = scalar_lea.vmem %s1291_s0, %s1044_s26  ;;  %v1046_v21 = vld [vmem:[%s1294_s3] sm:$0xff]  ;;  %v1057_v42 = vld [vmem:[%s1295_s4 + $0x38] sm:$0xff]  ;;  %v1056_v44 = vld [vmem:[%s1295_s4 + $0x30] sm:$0xff]  ;;  %s1045_s16 = sshll.u32 %s1300_s25, 5 }
   0xe   : > { %v280_v0 = vld [vmem:[%s273_s29] sm:$0xff]  ;;  %v281_v1 = vld [vmem:[%s273_s29 + $0x8] sm:$0xff]  ;;  %v1067_v43 = vld [vmem:[%s1295_s4 + $0x78] sm:$0xff]  ;;  %481 = vmatpush.bf16.msra.mxu1 %v1057_v42  ;;  %s278_s21 = scalar_lea.vmem %s1298_s7, %s1045_s16 }
   0xf   : > { %v283_v2 = vsel %vm282_vm0, %v280_v0, 0.0  ;;  %v284_v3 = vsel %vm282_vm0, %v281_v1, 0.0  ;;  %v321_v34 = vadd.f32 1.0, %v280_v0  ;;  %v322_v35 = vadd.f32 1.0, %v281_v1  ;;  %565 = vmatpush.bf16.msra.mxu2 %v1067_v43  ;;  %v1066_v45 = vld [vmem:[%s1295_s4 + $0x70] sm:$0xff]  ;;  %v1055_v46 = vld [vmem:[%s1295_s4 + $0x28] sm:$0xff] }
  0x10   : > { %v285_v4 = vadd.f32 %v284_v3, %v283_v2  ;;  %407 = vmatpush.bf16.msra.mxu0 %v1048_v15  ;;  %v1065_v47 = vld [vmem:[%s1295_s4 + $0x68] sm:$0xff]  ;;  %v1054_v52 = vld [vmem:[%s1295_s4 + $0x20] sm:$0xff]  ;;  %v1053_v54 = vld [vmem:[%s1295_s4 + $0x18] sm:$0xff] }
  0x11   : > { %v1064_v53 = vld [vmem:[%s1295_s4 + $0x60] sm:$0xff]  ;;  %v1063_v55 = vld [vmem:[%s1295_s4 + $0x58] sm:$0xff]  ;;  %v1052_v15 = vld [vmem:[%s1295_s4 + $0x10] sm:$0xff] }
  0x12   : > { %v286_v5 = vrot.slane %v285_v4, 4  ;;  %482 = vmatpush.bf16.msra.mxu1 %v1056_v44 }
  0x13   : > { %566 = vmatpush.bf16.msra.mxu2 %v1066_v45 }
  0x14   : > { %v287_v6 = vadd.f32 %v286_v5, %v285_v4  ;;  %408 = vmatpush.bf16.msra.mxu0 %v1047_v16  ;;  %v1062_v16 = vld [vmem:[%s1295_s4 + $0x50] sm:$0xff] }
  0x16   : > { %v288_v7 = vrot.slane %v287_v6, 2  ;;  %483 = vmatpush.bf16.msra.mxu1 %v1055_v46 }
  0x17   : > { %567 = vmatpush.bf16.msra.mxu2 %v1065_v47 }
  0x18   : > { %v289_v8 = vadd.f32 %v288_v7, %v287_v6  ;;  %409 = vmatpush.bf16.msra.mxu0 %v1046_v21 }
  0x1a   : > { %v290_v9 = vrot.slane %v289_v8, 1  ;;  %484 = vmatpush.bf16.msra.mxu1 %v1054_v52 }
  0x1b   : > { %568 = vmatpush.bf16.msra.mxu2 %v1064_v53 }
  0x1c   : > { %v291_v11 = vadd.f32 %v290_v9, %v289_v8 }
  0x1e   : > { %v293_v12 = vmul.f32 %v292_v10, %v291_v11  ;;  %485 = vmatpush.bf16.msra.mxu1 %v1053_v54  ;;  %v1089_v54 = vld [vmem:[%s1297_s6] ss:$0 sm:$0xff] }
  0x1f   : > { %569 = vmatpush.bf16.msra.mxu2 %v1063_v55 }
  0x20   : > { %v295_v13 = vsel %vm294_vm1, %v293_v12, 0.0 }
  0x21   : > { %296 = vadd.xlane.f32.xlu0 %v295_v13 }
  0x22   : > { %486 = vmatpush.bf16.msra.mxu1 %v1052_v15 }
  0x23   : > { %570 = vmatpush.bf16.msra.mxu2 %v1062_v16 }
  0x94   : > { %v297_v17 = vpop.xlane.xlu0 %296 }
  0x95   : > { %v298_v19 = vmax.f32 %v297_v17, 0.0  ;;  %v1051_v17 = vld [vmem:[%s1295_s4 + $0x8] sm:$0xff] }
  0x96   : > { %487 = vmatpush.bf16.msra.mxu1 %v1051_v17 }
  0x97   : > { %v300_v20 = vmul.f32 %v299_v18, %v298_v19  ;;  %v1061_v18 = vld [vmem:[%s1295_s4 + $0x48] sm:$0xff]  ;;  %v1050_v19 = vld [vmem:[%s1295_s4] sm:$0xff] }
  0x98   : > { %571 = vmatpush.bf16.msra.mxu2 %v1061_v18 }
  0x99   : > { %v856_v22 = vmul.f32 -1.442695, %v300_v20  ;;  %v1060_v20 = vld [vmem:[%s1295_s4 + $0x40] sm:$0xff] }
  0x9a   : > { %488 = vmatpush.bf16.msra.mxu1 %v1050_v19 }
  0x9b   : > { %1090 = vpow2.f32 %v856_v22 }
  0x9c   : > { %572 = vmatpush.bf16.msra.mxu2 %v1060_v20 }
  0xa1   : > { %v1091_v23 = vpop.eup %1090 }
  0xa2   : > { %v305_v24 = vadd.f32 1.0, %v1091_v23 }
  0xa4   : > { %1092 = vrcp.f32 %v305_v24  ;;  %v317_v28 = vand.u32 2147483648, %v305_v24  ;;  %v315_v30 = vand.u32 2147483647, %v305_v24  ;;  %vm311_vm3 = vweird.f32 %v305_v24 }
  0xa6   : > { %v318_v32 = vor.u32 1.1754944e-38, %v317_v28  ;;  %vm316_vm5 = vcmp.eq.f32.partialorder %v315_v30, 8.507059e+37  ;;  %v1058_v28 = vld [vmem:[%s1296_s5] sm:$0xff]  ;;  %v1077_v30 = vld [vmem:[%s1295_s4 + $0xb8] sm:$0xff] }
  0xaa   : > { %v1093_v25 = vpop.eup %1092 }
  0xab   : > { %v307_v26 = vmul.f32 %v1093_v25, %v305_v24  ;;  %vm312_vm2 = vweird.f32 %v1093_v25 }
  0xac   : > { %vm313_vm4 = vmor %vm311_vm3, %vm312_vm2 }
  0xad   : > { %v308_v27 = vsub.f32 1.0, %v307_v26 }
  0xaf   : > { %v309_v29 = vmul.f32 %v1093_v25, %v308_v27 }
  0xb1   : > { %v310_v31 = vadd.f32 %v1093_v25, %v309_v29 }
  0xb3   : > { %v314_v33 = vsel %vm313_vm4, %v1093_v25, %v310_v31 }
  0xb4   : > { %v319_v36 = vsel %vm316_vm5, %v318_v32, %v314_v33  ;;  %v1068_v32 = vld [vmem:[%s1296_s5 + $0x10] sm:$0xff] }
  0xb5   : > { %v323_v37 = vperm.slane %v319_v36, 0  ;;  %v1076_v33 = vld [vmem:[%s1295_s4 + $0xb0] sm:$0xff]  ;;  %v1059_v36 = vld [vmem:[%s1296_s5 + $0x8] sm:$0xff] }
  0xb7   : > { %v324_v38 = vmul.f32 %v323_v37, %v321_v34  ;;  %v325_v39 = vmul.f32 %v323_v37, %v322_v35  ;;  %v1075_v34 = vld [vmem:[%s1295_s4 + $0xa8] sm:$0xff]  ;;  %v1074_v35 = vld [vmem:[%s1295_s4 + $0xa0] sm:$0xff]  ;;  %v1073_v37 = vld [vmem:[%s1295_s4 + $0x98] sm:$0xff] }
  0xb9   : > { %v857_v40 = vmul.f32 -1.442695, %v324_v38  ;;  %v858_v41 = vmul.f32 -1.442695, %v325_v39 }
  0xbb   : > { %1094 = vpow2.f32 %v857_v40  ;;  %v1071_v40 = vld [vmem:[%s1295_s4 + $0x88] sm:$0xff] }
  0xbc   : > { %1096 = vpow2.f32 %v858_v41  ;;  %v1070_v41 = vld [vmem:[%s1295_s4 + $0x80] sm:$0xff] }
  0xc1   : > { %v1095_v48 = vpop.eup %1094 }
  0xc2   : > { %v1097_v49 = vpop.eup %1096  ;;  %v332_v50 = vadd.f32 1.0, %v1095_v48 }
  0xc3   : > { %v333_v51 = vadd.f32 1.0, %v1097_v49  ;;  %v1078_v49 = vld [vmem:[%s1296_s5 + $0x20] sm:$0xff] }
  0xc4   : > { %1098 = vrcp.f32 %v332_v50  ;;  %v345_v61 = vand.u32 2147483648, %v332_v50  ;;  %v343_v0 = vand.u32 2147483647, %v332_v50  ;;  %vm339_vm8 = vweird.f32 %v332_v50 }
  0xc5   : > { %1100 = vrcp.f32 %v333_v51  ;;  %v360_v1 = vand.u32 2147483648, %v333_v51  ;;  %v358_v3 = vand.u32 2147483647, %v333_v51  ;;  %vm354_vm10 = vweird.f32 %v333_v51 }
  0xc6   : > { %v346_v5 = vor.u32 1.1754944e-38, %v345_v61  ;;  %vm344_vm11 = vcmp.eq.f32.partialorder %v343_v0, 8.507059e+37 }
  0xc7   : > { %v361_v8 = vor.u32 1.1754944e-38, %v360_v1  ;;  %vm359_vm13 = vcmp.eq.f32.partialorder %v358_v3, 8.507059e+37 }
  0xca   : > { %v1099_v56 = vpop.eup %1098 }
  0xcb   : > { %v1101_v57 = vpop.eup %1100  ;;  %v335_v58 = vmul.f32 %v1099_v56, %v332_v50  ;;  %vm340_vm6 = vweird.f32 %v1099_v56  ;;  %v1079_v50 = vld [vmem:[%s1296_s5 + $0x28] sm:$0xff] }
  0xcc   : > { %v350_v59 = vmul.f32 %v1101_v57, %v333_v51  ;;  %vm355_vm7 = vweird.f32 %v1101_v57  ;;  %vm341_vm9 = vmor %vm339_vm8, %vm340_vm6 }
  0xcd   : > { %v336_v60 = vsub.f32 1.0, %v335_v58  ;;  %vm356_vm12 = vmor %vm354_vm10, %vm355_vm7 }
  0xce   : > { %v351_v62 = vsub.f32 1.0, %v350_v59 }
  0xcf   : > { %v337_v63 = vmul.f32 %v1099_v56, %v336_v60 }
  0xd0   : > { %v352_v2 = vmul.f32 %v1101_v57, %v351_v62 }
  0xd1   : > { %v338_v4 = vadd.f32 %v1099_v56, %v337_v63 }
  0xd2   : > { %v353_v6 = vadd.f32 %v1101_v57, %v352_v2 }
  0xd3   : > { %v342_v7 = vsel %vm341_vm9, %v1099_v56, %v338_v4 }
  0xd4   : > { %v347_v9 = vsel %vm344_vm11, %v346_v5, %v342_v7  ;;  %v357_v10 = vsel %vm356_vm12, %v1101_v57, %v353_v6 }
  0xd5   : > { %v362_v11 = vsel %vm359_vm13, %v361_v8, %v357_v10  ;;  %v364_v12 = vmul.f32 %v347_v9, %v324_v38  ;;  %v1069_v38 = vld [vmem:[%s1296_s5 + $0x18] sm:$0xff] }
  0xd6   : > { %v365_v13 = vmul.f32 %v362_v11, %v325_v39  ;;  %v1072_v39 = vld [vmem:[%s1295_s4 + $0x90] sm:$0xff] }
  0xd8   : > { %v366_v14 = vpack.c.bf16 %v365_v13, %v364_v12 }
  0xda   : > { %875 = vmatmul.msk.bf16.vlgmr.msra.gmra.mxu0 %vm282_vm0, %v366_v14 }
 0x157   : > { %v411_v21 = vpop.f32.mrf.mxu0 }
 0x15f   : > { %v413_v22 = vpop.f32.mrf.mxu0 }
 0x160   : > { %v416_v23 = vpack.c.bf16 %v413_v22, %v411_v21 }
 0x162   : > { %489 = vmatmul.bf16.vlgmr.msra.gmra.mxu1 %v416_v23  ;;  %573 = vmatmul.bf16.vlgmr.msra.gmra.mxu2 %v416_v23 }
 0x1df   : > { %v490_v24 = vpop.f32.mrf.mxu1 }
 0x1e5   : > { %v574_v25 = vpop.f32.mrf.mxu2 }
 0x1e7   : > { %v492_v26 = vpop.f32.mrf.mxu1 }
 0x1e8   : > { %v499_v27 = vpack.c.bf16 %v492_v26, %v490_v24 }
 0x1ea   : > { %644 = vmatpush.bf16.msrb.mxu0 %v499_v27 }
 0x1ed   : > { %v576_v29 = vpop.f32.mrf.mxu2  ;;  %978 = vmatmul.msk.bf16.vlgmr.msrb.gmra.mxu0 %vm595_vm14, %v1058_v28 }
 0x1ee   : > { %v584_v31 = vpack.c.bf16 %v576_v29, %v574_v25 }
 0x1f0   : > { %609 = vmatpush.bf16.msra.mxu3 %v584_v31 }
 0x1f3   : > { %968 = vmatmul.msk.bf16.vlgmr.msra.gmra.mxu3 %vm595_vm14, %v1068_v32 }
 0x1f4   : > { %721 = vmatpush.bf16.msrb.mxu3 %v1077_v30 }
 0x1f8   : > { %722 = vmatpush.bf16.msrb.mxu3 %v1076_v33 }
 0x1fc   : > { %723 = vmatpush.bf16.msrb.mxu3 %v1075_v34 }
 0x1fd   : > { %979 = vmatmul.msk.bf16.gmra.mxu0 %vm595_vm14, %v1059_v36 }
 0x200   : > { %724 = vmatpush.bf16.msrb.mxu3 %v1074_v35 }
 0x203   : > { %969 = vmatmul.msk.bf16.gmra.mxu3 %vm595_vm14, %v1069_v38 }
 0x204   : > { %725 = vmatpush.bf16.msrb.mxu3 %v1073_v37 }
 0x208   : > { %726 = vmatpush.bf16.msrb.mxu3 %v1072_v39 }
 0x20c   : > { %727 = vmatpush.bf16.msrb.mxu3 %v1071_v40 }
 0x210   : > { %728 = vmatpush.bf16.msrb.mxu3 %v1070_v41 }
 0x213   : > { %729 = vmatmul.bf16.vlgmr.msrb.gmra.mxu3 %v416_v23 }
 0x26a   : > { %v646_v51 = vpop.f32.mrf.mxu0 }
 0x272   : > { %v648_v52 = vpop.f32.mrf.mxu0 }
 0x276   : > { %v611_v42 = vpop.f32.mrf.mxu3 }
 0x277   : > { %v647_v53 = vadd.f32 %v646_v51, %v611_v42 }
 0x27a   : > { %v651_v55 = vpop.f32.mrf.mxu0 }
 0x27e   : > { %v613_v43 = vpop.f32.mrf.mxu3 }
 0x27f   : > { %v649_v61 = vadd.f32 %v648_v52, %v613_v43 }
 0x282   : > { %v653_v2 = vpop.f32.mrf.mxu0 }
 0x286   : > { %v616_v44 = vpop.f32.mrf.mxu3 }
 0x287   : > { %v652_v59 = vadd.f32 %v651_v55, %v616_v44 }
 0x28e   : > { %v618_v45 = vpop.f32.mrf.mxu3 }
 0x28f   : > { %v654_v4 = vadd.f32 %v653_v2, %v618_v45 }
 0x296   : > { %v730_v46 = vpop.f32.mrf.mxu3 }
 0x29e   : > { %v732_v47 = vpop.f32.mrf.mxu3 }
 0x29f   : > { %v740_v48 = vpack.c.bf16 %v732_v47, %v730_v46 }
 0x2a1   : > { %764 = vmatpush.bf16.msrb.mxu1 %v740_v48  ;;  %1080 = vmatpush.bf16.msrb.mxu2 %v740_v48 }
 0x2a4   : > { %1040 = vmatmul.msk.bf16.vlgmr.msrb.gmra.mxu1 %vm595_vm14, %v1078_v49  ;;  %1041 = vmatmul.msk.bf16.vlgmr.msrb.gmra.mxu2 %vm595_vm14, %v1079_v50 }
 0x321   : > { %v766_v56 = vpop.f32.mrf.mxu1 }
 0x322   : > { %v776_v57 = vadd.f32 %v766_v56, %v647_v53 }
 0x324   : > { %v784_v58 = vadd.f32 %v1089_v54, %v776_v57 }
 0x326   : > { %788 = vst [vmem:[%s278_s21] sm:$0xff] %v784_v58 }
 0x327   : > { %v771_v60 = vpop.f32.mrf.mxu2 }
 0x328   : > { %v778_v62 = vadd.f32 %v771_v60, %v652_v59 }
 0x329   : > { %v768_v63 = vpop.f32.mrf.mxu1 }
 0x32a   : > { %v786_v0 = vadd.f32 %v1089_v54, %v778_v62  ;;  %v777_v1 = vadd.f32 %v768_v63, %v649_v61 }
 0x32c   : > { %790 = vst [vmem:[%s278_s21 + $0x10] sm:$0xff] %v786_v0  ;;  %v785_v3 = vadd.f32 %v1089_v54, %v777_v1 }
 0x32e   : > { %789 = vst [vmem:[%s278_s21 + $0x8] sm:$0xff] %v785_v3 }
 0x32f   : > { %v773_v5 = vpop.f32.mrf.mxu2 }
 0x330   : > { %v779_v6 = vadd.f32 %v773_v5, %v654_v4 }
 0x332   : > { %v787_v7 = vadd.f32 %v1089_v54, %v779_v6 }
 0x334   : > { %791 = vst [vmem:[%s278_s21 + $0x18] sm:$0xff] %v787_v7 }
 0x335 PF: > { %s17_s24 = sadd.s32 1, %s1108_s24  }
 0x336   : > { %p14_p4 = scmp.ge.s32.totalorder %s17_s24, 4  }
 0x338   :  { %16 = sbr.rel (!%p14_p4) target bundleno = 1 (0x1), region = 82 }

</bundles_post_ra>
